<compile_context>
chip_gen: v7x
topology: tpu7x:2x2x1
jax: 0.10.0
libtpu: 0.0.40
codegen_flags: <defaults>
</compile_context>

<pallas_src>
import math

import jax
import jax.numpy as jnp
from jax import lax
from jax.experimental import pallas as pl
from jax.experimental.pallas import tpu as pltpu


# ---------------------------------------------------------------------------
# Stage 1: conv + pooling + linear + attention + z (frame-major) + BN partials
# ---------------------------------------------------------------------------
def _stage1_kernel(xp_ref, wbig_ref, bias_ref, wlin_ref, wlin_t_ref,
                   blin_col_ref, blin_row_ref, avgmask_ref, maxsel_ref, e_c_ref,
                   z_ref, stats_ref):
    B, Tp, _CinV = xp_ref.shape
    K = wbig_ref.shape[0]
    CoutV = wbig_ref.shape[2]
    T = wlin_ref.shape[0]
    Cout = e_c_ref.shape[1]
    V = CoutV // Cout
    Ch = Cout // 2
    inv_avg = 1.0 / float(Ch * V)
    neg_big = float(jnp.finfo(jnp.float32).min)

    avgmask = avgmask_ref[...]                    # (1, CoutV) 1.0 on first-half chans
    maxsel = maxsel_ref[...] != 0.0               # (1, CoutV) True on last-half chans
    bias_row = bias_ref[...]                      # (1, CoutV)

    for b in range(B):                            # B is small & static -> unrolled
        xb = xp_ref[b]                            # (Tp, Cin*V) padded frame-major

        # ---- temporal conv (K,1): K accumulated matmuls vs V-expanded weights ----
        y = jnp.dot(xb[0:T, :], wbig_ref[0], preferred_element_type=jnp.float32)
        for k in range(1, K):
            y = y + jnp.dot(xb[k:k + T, :], wbig_ref[k],
                            preferred_element_type=jnp.float32)
        y = y + bias_row                                            # (T, Cout*V)

        # ---- adaptive avg pool over (first Cout/2 chans, V) -> row (1, T) ----
        qpool = lax.dot_general(avgmask, y, (((1,), (1,)), ((), ())),
                                preferred_element_type=jnp.float32) * inv_avg

        # ---- adaptive max pool over (last Cout/2 chans, V) -> col (T, 1) ----
        kpool = jnp.max(jnp.where(maxsel, y, neg_big), axis=1, keepdims=True)

        # ---- shared Linear(Frames, Frames) + ReLU ----
        q_row = jnp.maximum(
            jnp.dot(qpool, wlin_t_ref[...], preferred_element_type=jnp.float32)
            + blin_row_ref[...], 0.0)                               # (1, T)  Q[t]
        k_col = jnp.maximum(
            jnp.dot(wlin_ref[...], kpool, preferred_element_type=jnp.float32)
            + blin_col_ref[...], 0.0)                               # (T, 1)  K[m]

        # ---- attention (transposed): attenT[m, t] = sigmoid(K[m] * Q[t]) (VPU) ----
        atten_t = jax.nn.sigmoid(k_col * q_row)                     # (T, T)

        # ---- z_frame[m, c*V+v] = sum_t atten[t,m] * y[t, c*V+v] : one matmul ----
        z = jnp.dot(atten_t, y, preferred_element_type=jnp.float32)  # (T, Cout*V)
        z_ref[b] = z

        # ---- per-sample per-channel BN partials: sum and sum-of-squares ----
        colsum = jnp.sum(z, axis=0, keepdims=True)                  # (1, Cout*V)
        colsq = jnp.sum(z * z, axis=0, keepdims=True)               # (1, Cout*V)
        s1 = jnp.dot(colsum, e_c_ref[...], preferred_element_type=jnp.float32)
        s2 = jnp.dot(colsq, e_c_ref[...], preferred_element_type=jnp.float32)
        stats_ref[b] = jnp.concatenate([s1, s2], axis=0)            # (2, Cout)


# ---------------------------------------------------------------------------
# Stage 2: apply precomputed BN scale/shift in place (combine hoisted to wrapper)
# ---------------------------------------------------------------------------
def _stage2_kernel(z_ref, scale_ref, shift_ref, out_ref):
    scale = scale_ref[...]                                          # (1, Cout*V)
    shift = shift_ref[...]                                          # (1, Cout*V)
    for b in range(z_ref.shape[0]):
        out_ref[b] = z_ref[b] * scale + shift


# ---------------------------------------------------------------------------
# Wrapper
# ---------------------------------------------------------------------------
@jax.jit
def temporal_tran_forward(x, params):
    """x: (N, Cin, T, V) float32. Returns (N, Cout, T, V) float32."""
    wconv, bconv, wlin, blin, gamma, beta = params
    N, Cin, T, V = x.shape
    Cout = wconv.shape[0]
    K = wconv.shape[2]
    pad = (K - 1) // 2
    Tp = T + 2 * pad
    CinV = Cin * V
    CoutV = Cout * V
    Ch = Cout // 2
    eps = 1e-5

    # Batch B samples per grid step (amortizes the ~0.35us/step overhead).
    B = next(b for b in (4, 2, 1) if N % b == 0)
    steps = N // B

    # ---- host-side layout plumbing (XLA): frame-major input + packed constants ----
    xf = jnp.transpose(x, (0, 2, 1, 3)).reshape(N, T, CinV)
    xf = jnp.pad(xf, ((0, 0), (pad, pad), (0, 0)))                  # (N, Tp, Cin*V)

    # V-expanded conv weight: wbig[k, cin*V+v', c*V+v] = wconv[c, cin, k, 0]*[v'==v]
    eye_v = jnp.eye(V, dtype=jnp.float32)
    wbig = jnp.einsum('oik,vw->kivow', wconv[:, :, :, 0], eye_v).reshape(K, CinV, CoutV)
    bias_row = jnp.repeat(bconv, V)[None, :]                        # (1, Cout*V)

    wlin_t = wlin.T
    blin_col = blin.reshape(T, 1)
    blin_row = blin.reshape(1, T)

    chan = jnp.arange(CoutV) // V
    avgmask = (chan < Ch).astype(jnp.float32)[None, :]              # (1, Cout*V)
    maxsel = (chan >= Ch).astype(jnp.float32)[None, :]              # (1, Cout*V)
    e_c = (chan[:, None] == jnp.arange(Cout)[None, :]).astype(jnp.float32)  # (CoutV, Cout)

    cp = pltpu.CompilerParams(dimension_semantics=("parallel",))
    full2 = lambda i: (0, 0)
    full3 = lambda i: (0, 0, 0)

    z, stats = pl.pallas_call(
        _stage1_kernel,
        out_shape=(jax.ShapeDtypeStruct((N, T, CoutV), jnp.float32),
                   jax.ShapeDtypeStruct((N, 2, Cout), jnp.float32)),
        grid_spec=pltpu.PrefetchScalarGridSpec(
            num_scalar_prefetch=0,
            grid=(steps,),
            in_specs=[
                pl.BlockSpec((B, Tp, CinV), lambda i: (i, 0, 0)),   # padded input
                pl.BlockSpec((K, CinV, CoutV), full3),              # expanded conv W
                pl.BlockSpec((1, CoutV), full2),                    # conv bias row
                pl.BlockSpec((T, T), full2),                        # linear weight
                pl.BlockSpec((T, T), full2),                        # linear weight^T
                pl.BlockSpec((T, 1), full2),                        # linear bias (col)
                pl.BlockSpec((1, T), full2),                        # linear bias (row)
                pl.BlockSpec((1, CoutV), full2),                    # avg-pool mask
                pl.BlockSpec((1, CoutV), full2),                    # max-pool select
                pl.BlockSpec((CoutV, Cout), full2),                 # channel block-sum
            ],
            out_specs=[
                pl.BlockSpec((B, T, CoutV), lambda i: (i, 0, 0)),   # z (frame-major)
                pl.BlockSpec((B, 2, Cout), lambda i: (i, 0, 0)),    # BN partials
            ],
        ),
        compiler_params=cp,
    )(xf, wbig, bias_row, wlin, wlin_t, blin_col, blin_row, avgmask, maxsel, e_c)

    # ---- tiny cross-sample BN combine in XLA (hoisted out of the kernel) ----
    count = float(N * T * V)
    s1 = jnp.sum(stats[:, 0, :], axis=0)                            # (Cout,)
    s2 = jnp.sum(stats[:, 1, :], axis=0)                            # (Cout,)
    mean = s1 / count
    var = jnp.maximum(s2 / count - mean * mean, 0.0)                # biased variance
    scale = gamma * lax.rsqrt(var + eps)
    shift = beta - mean * scale
    scale_row = jnp.repeat(scale, V)[None, :]                       # (1, Cout*V)
    shift_row = jnp.repeat(shift, V)[None, :]                       # (1, Cout*V)

    out_fm = pl.pallas_call(
        _stage2_kernel,
        out_shape=jax.ShapeDtypeStruct((N, T, CoutV), jnp.float32),
        grid_spec=pltpu.PrefetchScalarGridSpec(
            num_scalar_prefetch=0,
            grid=(steps,),
            in_specs=[
                pl.BlockSpec((B, T, CoutV), lambda i: (i, 0, 0)),   # z (aliased)
                pl.BlockSpec((1, CoutV), full2),                    # scale row
                pl.BlockSpec((1, CoutV), full2),                    # shift row
            ],
            out_specs=pl.BlockSpec((B, T, CoutV), lambda i: (i, 0, 0)),
        ),
        compiler_params=cp,
        input_output_aliases={0: 0},                                # normalize in place
    )(z, scale_row, shift_row)

    # inverse of the frame-major layout: (N, T, Cout*V) -> (N, Cout, T, V)
    return jnp.transpose(out_fm.reshape(N, T, Cout, V), (0, 2, 1, 3))


# ---------------------------------------------------------------------------
# Parameter init mirroring the PyTorch module's __init__
# ---------------------------------------------------------------------------
def init_params(key, in_channels, out_channels, frames, kernel_size):
    k1, k2, k3 = jax.random.split(key, 3)
    # conv: kaiming_normal_(mode='fan_out'), gain=sqrt(2)
    fan_out = out_channels * kernel_size * 1
    wconv = jax.random.normal(k1, (out_channels, in_channels, kernel_size, 1),
                              jnp.float32) * math.sqrt(2.0 / fan_out)
    bconv = jnp.zeros((out_channels,), jnp.float32)
    # linear: xavier_uniform_ with gain = calculate_gain('relu') = sqrt(2)
    bound = math.sqrt(2.0) * math.sqrt(6.0 / (frames + frames))
    wlin = jax.random.uniform(k2, (frames, frames), jnp.float32, -bound, bound)
    lb = 1.0 / math.sqrt(frames)
    blin = jax.random.uniform(k3, (frames,), jnp.float32, -lb, lb)
    # BatchNorm2d affine params at init
    gamma = jnp.ones((out_channels,), jnp.float32)
    beta = jnp.zeros((out_channels,), jnp.float32)
    return wconv, bconv, wlin, blin, gamma, beta


# ---------------------------------------------------------------------------
# Pure-JAX reference matching the PyTorch forward (training-mode BN)
# ---------------------------------------------------------------------------
def reference_forward(x, params):
    wconv, bconv, wlin, blin, gamma, beta = params
    K = wconv.shape[2]
    pad = (K - 1) // 2
    y = lax.conv_general_dilated(x, wconv, window_strides=(1, 1),
                                 padding=((pad, pad), (0, 0)),
                                 dimension_numbers=('NCHW', 'OIHW', 'NCHW'))
    y = y + bconv[None, :, None, None]
    _, C, T, V = y.shape
    Ch = C // 2
    q = jnp.mean(y[:, :Ch], axis=(1, 3))                 # (N, T)
    kv = jnp.max(y[:, Ch:], axis=(1, 3))                 # (N, T)
    q = jax.nn.relu(q @ wlin.T + blin)
    kv = jax.nn.relu(kv @ wlin.T + blin)
    atten = jax.nn.sigmoid(jnp.einsum('nt,nm->ntm', q, kv))
    z = jnp.einsum('nctv,ntm->ncmv', y, atten)
    mean = jnp.mean(z, axis=(0, 2, 3), keepdims=True)
    var = jnp.mean((z - mean) ** 2, axis=(0, 2, 3), keepdims=True)
    return ((z - mean) / jnp.sqrt(var + 1e-5) * gamma[None, :, None, None]
            + beta[None, :, None, None])


if __name__ == "__main__":
    key = jax.random.PRNGKey(0)
    kx, kp = jax.random.split(key)

    N, Cin, Cout, Frames, V, K = 2, 4, 8, 8, 16, 3
    x = jax.random.normal(kx, (N, Cin, Frames, V), jnp.float32)
    params = init_params(kp, Cin, Cout, Frames, K)

    out = temporal_tran_forward(x, params)
    out = jax.block_until_ready(out)

    ref = reference_forward(x, params)
    max_err = float(jnp.max(jnp.abs(out - ref)))
    assert out.shape == (N, Cout, Frames, V), out.shape
    assert jnp.allclose(out, ref, rtol=1e-3, atol=1e-3), f"max abs err {max_err}"

    print("KERNEL_OK")
</pallas_src>

<mosaic_0001>
module attributes {stable_mosaic.version = 11 : i64} {
  func.func @_stage1_kernel(%arg0: i32, %arg1: memref<2x10x64xf32, #tpu.memory_space<vmem>>, %arg2: memref<3x64x128xf32, #tpu.memory_space<vmem>>, %arg3: memref<1x128xf32, #tpu.memory_space<vmem>>, %arg4: memref<8x8xf32, #tpu.memory_space<vmem>>, %arg5: memref<8x8xf32, #tpu.memory_space<vmem>>, %arg6: memref<8x1xf32, #tpu.memory_space<vmem>>, %arg7: memref<1x8xf32, #tpu.memory_space<vmem>>, %arg8: memref<1x128xf32, #tpu.memory_space<vmem>>, %arg9: memref<1x128xf32, #tpu.memory_space<vmem>>, %arg10: memref<128x8xf32, #tpu.memory_space<vmem>>, %arg11: memref<2x8x128xf32, #tpu.memory_space<vmem>>, %arg12: memref<2x2x8xf32, #tpu.memory_space<vmem>>) attributes {dimension_semantics = [#tpu.dimension_semantics<parallel>], iteration_bounds = array<i64: 1>, scalar_prefetch = 0 : i64, scratch_operands = 0 : i64, tpu.core_type = #tpu.core_type<tc>, window_params = [{transform_indices = @transform_0, window_bounds = array<i64: 2, 10, 64>}, {pipeline_mode = #tpu.pipeline_mode<synchronous>, transform_indices = @transform_1, window_bounds = array<i64: 3, 64, 128>}, {pipeline_mode = #tpu.pipeline_mode<synchronous>, transform_indices = @transform_2, window_bounds = array<i64: 1, 128>}, {pipeline_mode = #tpu.pipeline_mode<synchronous>, transform_indices = @transform_3, window_bounds = array<i64: 8, 8>}, {pipeline_mode = #tpu.pipeline_mode<synchronous>, transform_indices = @transform_4, window_bounds = array<i64: 8, 8>}, {pipeline_mode = #tpu.pipeline_mode<synchronous>, transform_indices = @transform_5, window_bounds = array<i64: 8, 1>}, {pipeline_mode = #tpu.pipeline_mode<synchronous>, transform_indices = @transform_6, window_bounds = array<i64: 1, 8>}, {pipeline_mode = #tpu.pipeline_mode<synchronous>, transform_indices = @transform_7, window_bounds = array<i64: 1, 128>}, {pipeline_mode = #tpu.pipeline_mode<synchronous>, transform_indices = @transform_8, window_bounds = array<i64: 1, 128>}, {pipeline_mode = #tpu.pipeline_mode<synchronous>, transform_indices = @transform_9, window_bounds = array<i64: 128, 8>}, {transform_indices = @transform_10, window_bounds = array<i64: 2, 8, 128>}, {transform_indices = @transform_11, window_bounds = array<i64: 2, 2, 8>}]} {
    %c0 = arith.constant 0 : index
    %c0_0 = arith.constant 0 : index
    %0 = vector.load %arg8[%c0, %c0_0] : memref<1x128xf32, #tpu.memory_space<vmem>>, vector<1x128xf32>
    %c0_1 = arith.constant 0 : index
    %c0_2 = arith.constant 0 : index
    %1 = vector.load %arg9[%c0_1, %c0_2] : memref<1x128xf32, #tpu.memory_space<vmem>>, vector<1x128xf32>
    %cst = arith.constant 0.000000e+00 : f32
    %2 = vector.broadcast %cst : f32 to vector<1x128xf32>
    %3 = arith.cmpf one, %1, %2 : vector<1x128xf32>
    %c0_3 = arith.constant 0 : index
    %c0_4 = arith.constant 0 : index
    %4 = vector.load %arg3[%c0_3, %c0_4] : memref<1x128xf32, #tpu.memory_space<vmem>>, vector<1x128xf32>
    %c0_5 = arith.constant 0 : index
    %c0_6 = arith.constant 0 : index
    %c0_7 = arith.constant 0 : index
    %5 = vector.load %arg1[%c0_5, %c0_6, %c0_7] : memref<2x10x64xf32, #tpu.memory_space<vmem>>, vector<1x10x64xf32>
    %6 = vector.shape_cast %5 : vector<1x10x64xf32> to vector<10x64xf32>
    %7 = vector.extract_strided_slice %6 {offsets = [0, 0], sizes = [8, 64], strides = [1, 1]} : vector<10x64xf32> to vector<8x64xf32>
    %c0_8 = arith.constant 0 : index
    %c0_9 = arith.constant 0 : index
    %c0_10 = arith.constant 0 : index
    %8 = vector.load %arg2[%c0_8, %c0_9, %c0_10] : memref<3x64x128xf32, #tpu.memory_space<vmem>>, vector<1x64x128xf32>
    %9 = vector.shape_cast %8 : vector<1x64x128xf32> to vector<64x128xf32>
    %cst_11 = arith.constant dense<0.000000e+00> : vector<8x128xf32>
    %10 = tpu.matmul %7, %9, %cst_11 {dimension_numbers = #tpu.dot_dimension_numbers<[1], [0], [0], [1], [0, 0, 1, 1], [], []>} : vector<8x64xf32>, vector<64x128xf32>, vector<8x128xf32> -> vector<8x128xf32>
    %11 = vector.extract_strided_slice %6 {offsets = [1, 0], sizes = [8, 64], strides = [1, 1]} : vector<10x64xf32> to vector<8x64xf32>
    %c1 = arith.constant 1 : index
    %c0_12 = arith.constant 0 : index
    %c0_13 = arith.constant 0 : index
    %12 = vector.load %arg2[%c1, %c0_12, %c0_13] : memref<3x64x128xf32, #tpu.memory_space<vmem>>, vector<1x64x128xf32>
    %13 = vector.shape_cast %12 : vector<1x64x128xf32> to vector<64x128xf32>
    %cst_14 = arith.constant dense<0.000000e+00> : vector<8x128xf32>
    %14 = tpu.matmul %11, %13, %cst_14 {dimension_numbers = #tpu.dot_dimension_numbers<[1], [0], [0], [1], [0, 0, 1, 1], [], []>} : vector<8x64xf32>, vector<64x128xf32>, vector<8x128xf32> -> vector<8x128xf32>
    %15 = arith.addf %10, %14 : vector<8x128xf32>
    %16 = vector.extract_strided_slice %6 {offsets = [2, 0], sizes = [8, 64], strides = [1, 1]} : vector<10x64xf32> to vector<8x64xf32>
    %c2 = arith.constant 2 : index
    %c0_15 = arith.constant 0 : index
    %c0_16 = arith.constant 0 : index
    %17 = vector.load %arg2[%c2, %c0_15, %c0_16] : memref<3x64x128xf32, #tpu.memory_space<vmem>>, vector<1x64x128xf32>
    %18 = vector.shape_cast %17 : vector<1x64x128xf32> to vector<64x128xf32>
    %cst_17 = arith.constant dense<0.000000e+00> : vector<8x128xf32>
    %19 = tpu.matmul %16, %18, %cst_17 {dimension_numbers = #tpu.dot_dimension_numbers<[1], [0], [0], [1], [0, 0, 1, 1], [], []>} : vector<8x64xf32>, vector<64x128xf32>, vector<8x128xf32> -> vector<8x128xf32>
    %20 = arith.addf %15, %19 : vector<8x128xf32>
    %21 = vector.broadcast %4 : vector<1x128xf32> to vector<8x128xf32>
    %22 = arith.addf %20, %21 : vector<8x128xf32>
    %cst_18 = arith.constant dense<0.000000e+00> : vector<1x8xf32>
    %23 = tpu.matmul %0, %22, %cst_18 {dimension_numbers = #tpu.dot_dimension_numbers<[1], [1], [0], [0], [0, 0, 1, 0], [], []>} : vector<1x128xf32>, vector<8x128xf32>, vector<1x8xf32> -> vector<1x8xf32>
    %cst_19 = arith.constant 1.562500e-02 : f32
    %24 = vector.broadcast %cst_19 : f32 to vector<1x8xf32>
    %25 = arith.mulf %23, %24 : vector<1x8xf32>
    %cst_20 = arith.constant -3.40282347E+38 : f32
    %26 = vector.shape_cast %3 : vector<1x128xi1> to vector<1x128xi1>
    %27 = vector.broadcast %26 : vector<1x128xi1> to vector<8x128xi1>
    %28 = vector.broadcast %cst_20 : f32 to vector<8x128xf32>
    %29 = arith.select %27, %22, %28 : vector<8x128xi1>, vector<8x128xf32>
    %cst_21 = arith.constant dense<0xFF800000> : vector<8xf32>
    %30 = vector.multi_reduction <maximumf>, %29, %cst_21 [1] : vector<8x128xf32> to vector<8xf32>
    %31 = vector.shape_cast %30 : vector<8xf32> to vector<8x1xf32>
    %c0_22 = arith.constant 0 : index
    %c0_23 = arith.constant 0 : index
    %32 = vector.load %arg5[%c0_22, %c0_23] : memref<8x8xf32, #tpu.memory_space<vmem>>, vector<8x8xf32>
    %cst_24 = arith.constant dense<0.000000e+00> : vector<1x8xf32>
    %33 = tpu.matmul %25, %32, %cst_24 {dimension_numbers = #tpu.dot_dimension_numbers<[1], [0], [0], [1], [0, 0, 1, 1], [], []>} : vector<1x8xf32>, vector<8x8xf32>, vector<1x8xf32> -> vector<1x8xf32>
    %c0_25 = arith.constant 0 : index
    %c0_26 = arith.constant 0 : index
    %34 = vector.load %arg7[%c0_25, %c0_26] : memref<1x8xf32, #tpu.memory_space<vmem>>, vector<1x8xf32>
    %35 = arith.addf %33, %34 : vector<1x8xf32>
    %cst_27 = arith.constant 0.000000e+00 : f32
    %36 = vector.broadcast %cst_27 : f32 to vector<1x8xf32>
    %37 = arith.maximumf %35, %36 : vector<1x8xf32>
    %c0_28 = arith.constant 0 : index
    %c0_29 = arith.constant 0 : index
    %38 = vector.load %arg4[%c0_28, %c0_29] : memref<8x8xf32, #tpu.memory_space<vmem>>, vector<8x8xf32>
    %cst_30 = arith.constant dense<0.000000e+00> : vector<8x1xf32>
    %39 = tpu.matmul %38, %31, %cst_30 {dimension_numbers = #tpu.dot_dimension_numbers<[1], [0], [0], [1], [0, 0, 1, 1], [], []>} : vector<8x8xf32>, vector<8x1xf32>, vector<8x1xf32> -> vector<8x1xf32>
    %c0_31 = arith.constant 0 : index
    %c0_32 = arith.constant 0 : index
    %40 = vector.load %arg6[%c0_31, %c0_32] : memref<8x1xf32, #tpu.memory_space<vmem>>, vector<8x1xf32>
    %41 = arith.addf %39, %40 : vector<8x1xf32>
    %cst_33 = arith.constant 0.000000e+00 : f32
    %42 = vector.broadcast %cst_33 : f32 to vector<8x1xf32>
    %43 = arith.maximumf %41, %42 : vector<8x1xf32>
    %44 = vector.broadcast %43 : vector<8x1xf32> to vector<8x8xf32>
    %45 = vector.broadcast %37 : vector<1x8xf32> to vector<8x8xf32>
    %46 = arith.mulf %44, %45 : vector<8x8xf32>
    %47 = arith.negf %46 : vector<8x8xf32>
    %48 = math.exp %47 : vector<8x8xf32>
    %cst_34 = arith.constant 1.000000e+00 : f32
    %49 = vector.broadcast %cst_34 : f32 to vector<8x8xf32>
    %50 = arith.addf %49, %48 : vector<8x8xf32>
    %51 = arith.divf %49, %50 : vector<8x8xf32>
    %cst_35 = arith.constant dense<0.000000e+00> : vector<8x128xf32>
    %52 = tpu.matmul %51, %22, %cst_35 {dimension_numbers = #tpu.dot_dimension_numbers<[1], [0], [0], [1], [0, 0, 1, 1], [], []>} : vector<8x8xf32>, vector<8x128xf32>, vector<8x128xf32> -> vector<8x128xf32>
    %c0_36 = arith.constant 0 : index
    %c0_37 = arith.constant 0 : index
    %c0_38 = arith.constant 0 : index
    %53 = vector.load %arg11[%c0_36, %c0_37, %c0_38] : memref<2x8x128xf32, #tpu.memory_space<vmem>>, vector<1x8x128xf32>
    %54 = vector.shape_cast %53 : vector<1x8x128xf32> to vector<8x128xf32>
    %55 = vector.shape_cast %52 : vector<8x128xf32> to vector<1x8x128xf32>
    tpu.vector_store %arg11[%c0_36, %c0_37, %c0_38], %55 {strides = array<i32>} : memref<2x8x128xf32, #tpu.memory_space<vmem>>, vector<1x8x128xf32>,
    %cst_39 = arith.constant dense<0.000000e+00> : vector<128xf32>
    %56 = vector.multi_reduction <add>, %52, %cst_39 [0] : vector<8x128xf32> to vector<128xf32>
    %57 = vector.shape_cast %56 : vector<128xf32> to vector<1x128xf32>
    %58 = arith.mulf %52, %52 : vector<8x128xf32>
    %cst_40 = arith.constant dense<0.000000e+00> : vector<128xf32>
    %59 = vector.multi_reduction <add>, %58, %cst_40 [0] : vector<8x128xf32> to vector<128xf32>
    %60 = vector.shape_cast %59 : vector<128xf32> to vector<1x128xf32>
    %c0_41 = arith.constant 0 : index
    %c0_42 = arith.constant 0 : index
    %61 = vector.load %arg10[%c0_41, %c0_42] : memref<128x8xf32, #tpu.memory_space<vmem>>, vector<128x8xf32>
    %cst_43 = arith.constant dense<0.000000e+00> : vector<1x8xf32>
    %62 = tpu.matmul %57, %61, %cst_43 {dimension_numbers = #tpu.dot_dimension_numbers<[1], [0], [0], [1], [0, 0, 1, 1], [], []>} : vector<1x128xf32>, vector<128x8xf32>, vector<1x8xf32> -> vector<1x8xf32>
    %c0_44 = arith.constant 0 : index
    %c0_45 = arith.constant 0 : index
    %63 = vector.load %arg10[%c0_44, %c0_45] : memref<128x8xf32, #tpu.memory_space<vmem>>, vector<128x8xf32>
    %cst_46 = arith.constant dense<0.000000e+00> : vector<1x8xf32>
    %64 = tpu.matmul %60, %63, %cst_46 {dimension_numbers = #tpu.dot_dimension_numbers<[1], [0], [0], [1], [0, 0, 1, 1], [], []>} : vector<1x128xf32>, vector<128x8xf32>, vector<1x8xf32> -> vector<1x8xf32>
    %65 = tpu.concatenate %62, %64 in 0 : vector<1x8xf32>, vector<1x8xf32> -> vector<2x8xf32>
    %c0_47 = arith.constant 0 : index
    %c0_48 = arith.constant 0 : index
    %c0_49 = arith.constant 0 : index
    %66 = vector.load %arg12[%c0_47, %c0_48, %c0_49] : memref<2x2x8xf32, #tpu.memory_space<vmem>>, vector<1x2x8xf32>
    %67 = vector.shape_cast %66 : vector<1x2x8xf32> to vector<2x8xf32>
    %68 = vector.shape_cast %65 : vector<2x8xf32> to vector<1x2x8xf32>
    tpu.vector_store %arg12[%c0_47, %c0_48, %c0_49], %68 {strides = array<i32>} : memref<2x2x8xf32, #tpu.memory_space<vmem>>, vector<1x2x8xf32>,
    %c1_50 = arith.constant 1 : index
    %c0_51 = arith.constant 0 : index
    %c0_52 = arith.constant 0 : index
    %69 = vector.load %arg1[%c1_50, %c0_51, %c0_52] : memref<2x10x64xf32, #tpu.memory_space<vmem>>, vector<1x10x64xf32>
    %70 = vector.shape_cast %69 : vector<1x10x64xf32> to vector<10x64xf32>
    %71 = vector.extract_strided_slice %70 {offsets = [0, 0], sizes = [8, 64], strides = [1, 1]} : vector<10x64xf32> to vector<8x64xf32>
    %c0_53 = arith.constant 0 : index
    %c0_54 = arith.constant 0 : index
    %c0_55 = arith.constant 0 : index
    %72 = vector.load %arg2[%c0_53, %c0_54, %c0_55] : memref<3x64x128xf32, #tpu.memory_space<vmem>>, vector<1x64x128xf32>
    %73 = vector.shape_cast %72 : vector<1x64x128xf32> to vector<64x128xf32>
    %cst_56 = arith.constant dense<0.000000e+00> : vector<8x128xf32>
    %74 = tpu.matmul %71, %73, %cst_56 {dimension_numbers = #tpu.dot_dimension_numbers<[1], [0], [0], [1], [0, 0, 1, 1], [], []>} : vector<8x64xf32>, vector<64x128xf32>, vector<8x128xf32> -> vector<8x128xf32>
    %75 = vector.extract_strided_slice %70 {offsets = [1, 0], sizes = [8, 64], strides = [1, 1]} : vector<10x64xf32> to vector<8x64xf32>
    %c1_57 = arith.constant 1 : index
    %c0_58 = arith.constant 0 : index
    %c0_59 = arith.constant 0 : index
    %76 = vector.load %arg2[%c1_57, %c0_58, %c0_59] : memref<3x64x128xf32, #tpu.memory_space<vmem>>, vector<1x64x128xf32>
    %77 = vector.shape_cast %76 : vector<1x64x128xf32> to vector<64x128xf32>
    %cst_60 = arith.constant dense<0.000000e+00> : vector<8x128xf32>
    %78 = tpu.matmul %75, %77, %cst_60 {dimension_numbers = #tpu.dot_dimension_numbers<[1], [0], [0], [1], [0, 0, 1, 1], [], []>} : vector<8x64xf32>, vector<64x128xf32>, vector<8x128xf32> -> vector<8x128xf32>
    %79 = arith.addf %74, %78 : vector<8x128xf32>
    %80 = vector.extract_strided_slice %70 {offsets = [2, 0], sizes = [8, 64], strides = [1, 1]} : vector<10x64xf32> to vector<8x64xf32>
    %c2_61 = arith.constant 2 : index
    %c0_62 = arith.constant 0 : index
    %c0_63 = arith.constant 0 : index
    %81 = vector.load %arg2[%c2_61, %c0_62, %c0_63] : memref<3x64x128xf32, #tpu.memory_space<vmem>>, vector<1x64x128xf32>
    %82 = vector.shape_cast %81 : vector<1x64x128xf32> to vector<64x128xf32>
    %cst_64 = arith.constant dense<0.000000e+00> : vector<8x128xf32>
    %83 = tpu.matmul %80, %82, %cst_64 {dimension_numbers = #tpu.dot_dimension_numbers<[1], [0], [0], [1], [0, 0, 1, 1], [], []>} : vector<8x64xf32>, vector<64x128xf32>, vector<8x128xf32> -> vector<8x128xf32>
    %84 = arith.addf %79, %83 : vector<8x128xf32>
    %85 = vector.broadcast %4 : vector<1x128xf32> to vector<8x128xf32>
    %86 = arith.addf %84, %85 : vector<8x128xf32>
    %cst_65 = arith.constant dense<0.000000e+00> : vector<1x8xf32>
    %87 = tpu.matmul %0, %86, %cst_65 {dimension_numbers = #tpu.dot_dimension_numbers<[1], [1], [0], [0], [0, 0, 1, 0], [], []>} : vector<1x128xf32>, vector<8x128xf32>, vector<1x8xf32> -> vector<1x8xf32>
    %cst_66 = arith.constant 1.562500e-02 : f32
    %88 = vector.broadcast %cst_66 : f32 to vector<1x8xf32>
    %89 = arith.mulf %87, %88 : vector<1x8xf32>
    %cst_67 = arith.constant -3.40282347E+38 : f32
    %90 = vector.shape_cast %3 : vector<1x128xi1> to vector<1x128xi1>
    %91 = vector.broadcast %90 : vector<1x128xi1> to vector<8x128xi1>
    %92 = vector.broadcast %cst_67 : f32 to vector<8x128xf32>
    %93 = arith.select %91, %86, %92 : vector<8x128xi1>, vector<8x128xf32>
    %cst_68 = arith.constant dense<0xFF800000> : vector<8xf32>
    %94 = vector.multi_reduction <maximumf>, %93, %cst_68 [1] : vector<8x128xf32> to vector<8xf32>
    %95 = vector.shape_cast %94 : vector<8xf32> to vector<8x1xf32>
    %c0_69 = arith.constant 0 : index
    %c0_70 = arith.constant 0 : index
    %96 = vector.load %arg5[%c0_69, %c0_70] : memref<8x8xf32, #tpu.memory_space<vmem>>, vector<8x8xf32>
    %cst_71 = arith.constant dense<0.000000e+00> : vector<1x8xf32>
    %97 = tpu.matmul %89, %96, %cst_71 {dimension_numbers = #tpu.dot_dimension_numbers<[1], [0], [0], [1], [0, 0, 1, 1], [], []>} : vector<1x8xf32>, vector<8x8xf32>, vector<1x8xf32> -> vector<1x8xf32>
    %c0_72 = arith.constant 0 : index
    %c0_73 = arith.constant 0 : index
    %98 = vector.load %arg7[%c0_72, %c0_73] : memref<1x8xf32, #tpu.memory_space<vmem>>, vector<1x8xf32>
    %99 = arith.addf %97, %98 : vector<1x8xf32>
    %cst_74 = arith.constant 0.000000e+00 : f32
    %100 = vector.broadcast %cst_74 : f32 to vector<1x8xf32>
    %101 = arith.maximumf %99, %100 : vector<1x8xf32>
    %c0_75 = arith.constant 0 : index
    %c0_76 = arith.constant 0 : index
    %102 = vector.load %arg4[%c0_75, %c0_76] : memref<8x8xf32, #tpu.memory_space<vmem>>, vector<8x8xf32>
    %cst_77 = arith.constant dense<0.000000e+00> : vector<8x1xf32>
    %103 = tpu.matmul %102, %95, %cst_77 {dimension_numbers = #tpu.dot_dimension_numbers<[1], [0], [0], [1], [0, 0, 1, 1], [], []>} : vector<8x8xf32>, vector<8x1xf32>, vector<8x1xf32> -> vector<8x1xf32>
    %c0_78 = arith.constant 0 : index
    %c0_79 = arith.constant 0 : index
    %104 = vector.load %arg6[%c0_78, %c0_79] : memref<8x1xf32, #tpu.memory_space<vmem>>, vector<8x1xf32>
    %105 = arith.addf %103, %104 : vector<8x1xf32>
    %cst_80 = arith.constant 0.000000e+00 : f32
    %106 = vector.broadcast %cst_80 : f32 to vector<8x1xf32>
    %107 = arith.maximumf %105, %106 : vector<8x1xf32>
    %108 = vector.broadcast %107 : vector<8x1xf32> to vector<8x8xf32>
    %109 = vector.broadcast %101 : vector<1x8xf32> to vector<8x8xf32>
    %110 = arith.mulf %108, %109 : vector<8x8xf32>
    %111 = arith.negf %110 : vector<8x8xf32>
    %112 = math.exp %111 : vector<8x8xf32>
    %cst_81 = arith.constant 1.000000e+00 : f32
    %113 = vector.broadcast %cst_81 : f32 to vector<8x8xf32>
    %114 = arith.addf %113, %112 : vector<8x8xf32>
    %115 = arith.divf %113, %114 : vector<8x8xf32>
    %cst_82 = arith.constant dense<0.000000e+00> : vector<8x128xf32>
    %116 = tpu.matmul %115, %86, %cst_82 {dimension_numbers = #tpu.dot_dimension_numbers<[1], [0], [0], [1], [0, 0, 1, 1], [], []>} : vector<8x8xf32>, vector<8x128xf32>, vector<8x128xf32> -> vector<8x128xf32>
    %c1_83 = arith.constant 1 : index
    %c0_84 = arith.constant 0 : index
    %c0_85 = arith.constant 0 : index
    %117 = vector.load %arg11[%c1_83, %c0_84, %c0_85] : memref<2x8x128xf32, #tpu.memory_space<vmem>>, vector<1x8x128xf32>
    %118 = vector.shape_cast %117 : vector<1x8x128xf32> to vector<8x128xf32>
    %119 = vector.shape_cast %116 : vector<8x128xf32> to vector<1x8x128xf32>
    tpu.vector_store %arg11[%c1_83, %c0_84, %c0_85], %119 {strides = array<i32>} : memref<2x8x128xf32, #tpu.memory_space<vmem>>, vector<1x8x128xf32>,
    %cst_86 = arith.constant dense<0.000000e+00> : vector<128xf32>
    %120 = vector.multi_reduction <add>, %116, %cst_86 [0] : vector<8x128xf32> to vector<128xf32>
    %121 = vector.shape_cast %120 : vector<128xf32> to vector<1x128xf32>
    %122 = arith.mulf %116, %116 : vector<8x128xf32>
    %cst_87 = arith.constant dense<0.000000e+00> : vector<128xf32>
    %123 = vector.multi_reduction <add>, %122, %cst_87 [0] : vector<8x128xf32> to vector<128xf32>
    %124 = vector.shape_cast %123 : vector<128xf32> to vector<1x128xf32>
    %c0_88 = arith.constant 0 : index
    %c0_89 = arith.constant 0 : index
    %125 = vector.load %arg10[%c0_88, %c0_89] : memref<128x8xf32, #tpu.memory_space<vmem>>, vector<128x8xf32>
    %cst_90 = arith.constant dense<0.000000e+00> : vector<1x8xf32>
    %126 = tpu.matmul %121, %125, %cst_90 {dimension_numbers = #tpu.dot_dimension_numbers<[1], [0], [0], [1], [0, 0, 1, 1], [], []>} : vector<1x128xf32>, vector<128x8xf32>, vector<1x8xf32> -> vector<1x8xf32>
    %c0_91 = arith.constant 0 : index
    %c0_92 = arith.constant 0 : index
    %127 = vector.load %arg10[%c0_91, %c0_92] : memref<128x8xf32, #tpu.memory_space<vmem>>, vector<128x8xf32>
    %cst_93 = arith.constant dense<0.000000e+00> : vector<1x8xf32>
    %128 = tpu.matmul %124, %127, %cst_93 {dimension_numbers = #tpu.dot_dimension_numbers<[1], [0], [0], [1], [0, 0, 1, 1], [], []>} : vector<1x128xf32>, vector<128x8xf32>, vector<1x8xf32> -> vector<1x8xf32>
    %129 = tpu.concatenate %126, %128 in 0 : vector<1x8xf32>, vector<1x8xf32> -> vector<2x8xf32>
    %c1_94 = arith.constant 1 : index
    %c0_95 = arith.constant 0 : index
    %c0_96 = arith.constant 0 : index
    %130 = vector.load %arg12[%c1_94, %c0_95, %c0_96] : memref<2x2x8xf32, #tpu.memory_space<vmem>>, vector<1x2x8xf32>
    %131 = vector.shape_cast %130 : vector<1x2x8xf32> to vector<2x8xf32>
    %132 = vector.shape_cast %129 : vector<2x8xf32> to vector<1x2x8xf32>
    tpu.vector_store %arg12[%c1_94, %c0_95, %c0_96], %132 {strides = array<i32>} : memref<2x2x8xf32, #tpu.memory_space<vmem>>, vector<1x2x8xf32>,
    return
  }
  func.func @transform_0(%arg0: i32) -> (i32, i32, i32) {
    %c0_i32 = arith.constant 0 : i32
    %c0_i32_0 = arith.constant 0 : i32
    %c0_i32_1 = arith.constant 0 : i32
    return %arg0, %c0_i32, %c0_i32_0 : i32, i32, i32
  }
  func.func @transform_1(%arg0: i32) -> (i32, i32, i32) {
    %c0_i32 = arith.constant 0 : i32
    %c0_i32_0 = arith.constant 0 : i32
    %c0_i32_1 = arith.constant 0 : i32
    %c0_i32_2 = arith.constant 0 : i32
    return %c0_i32, %c0_i32_0, %c0_i32_1 : i32, i32, i32
  }
  func.func @transform_2(%arg0: i32) -> (i32, i32) {
    %c0_i32 = arith.constant 0 : i32
    %c0_i32_0 = arith.constant 0 : i32
    %c0_i32_1 = arith.constant 0 : i32
    return %c0_i32, %c0_i32_0 : i32, i32
  }
  func.func @transform_3(%arg0: i32) -> (i32, i32) {
    %c0_i32 = arith.constant 0 : i32
    %c0_i32_0 = arith.constant 0 : i32
    %c0_i32_1 = arith.constant 0 : i32
    return %c0_i32, %c0_i32_0 : i32, i32
  }
  func.func @transform_4(%arg0: i32) -> (i32, i32) {
    %c0_i32 = arith.constant 0 : i32
    %c0_i32_0 = arith.constant 0 : i32
    %c0_i32_1 = arith.constant 0 : i32
    return %c0_i32, %c0_i32_0 : i32, i32
  }
  func.func @transform_5(%arg0: i32) -> (i32, i32) {
    %c0_i32 = arith.constant 0 : i32
    %c0_i32_0 = arith.constant 0 : i32
    %c0_i32_1 = arith.constant 0 : i32
    return %c0_i32, %c0_i32_0 : i32, i32
  }
  func.func @transform_6(%arg0: i32) -> (i32, i32) {
    %c0_i32 = arith.constant 0 : i32
    %c0_i32_0 = arith.constant 0 : i32
    %c0_i32_1 = arith.constant 0 : i32
    return %c0_i32, %c0_i32_0 : i32, i32
  }
  func.func @transform_7(%arg0: i32) -> (i32, i32) {
    %c0_i32 = arith.constant 0 : i32
    %c0_i32_0 = arith.constant 0 : i32
    %c0_i32_1 = arith.constant 0 : i32
    return %c0_i32, %c0_i32_0 : i32, i32
  }
  func.func @transform_8(%arg0: i32) -> (i32, i32) {
    %c0_i32 = arith.constant 0 : i32
    %c0_i32_0 = arith.constant 0 : i32
    %c0_i32_1 = arith.constant 0 : i32
    return %c0_i32, %c0_i32_0 : i32, i32
  }
  func.func @transform_9(%arg0: i32) -> (i32, i32) {
    %c0_i32 = arith.constant 0 : i32
    %c0_i32_0 = arith.constant 0 : i32
    %c0_i32_1 = arith.constant 0 : i32
    return %c0_i32, %c0_i32_0 : i32, i32
  }
  func.func @transform_10(%arg0: i32) -> (i32, i32, i32) {
    %c0_i32 = arith.constant 0 : i32
    %c0_i32_0 = arith.constant 0 : i32
    %c0_i32_1 = arith.constant 0 : i32
    return %arg0, %c0_i32, %c0_i32_0 : i32, i32, i32
  }
  func.func @transform_11(%arg0: i32) -> (i32, i32, i32) {
    %c0_i32 = arith.constant 0 : i32
    %c0_i32_0 = arith.constant 0 : i32
    %c0_i32_1 = arith.constant 0 : i32
    return %arg0, %c0_i32, %c0_i32_0 : i32, i32, i32
  }
}

module attributes {stable_mosaic.version = 11 : i64} {
  func.func @_stage2_kernel(%arg0: i32, %arg1: memref<2x8x128xf32, #tpu.memory_space<vmem>>, %arg2: memref<1x128xf32, #tpu.memory_space<vmem>>, %arg3: memref<1x128xf32, #tpu.memory_space<vmem>>, %arg4: memref<2x8x128xf32, #tpu.memory_space<vmem>>) attributes {dimension_semantics = [#tpu.dimension_semantics<parallel>], iteration_bounds = array<i64: 1>, scalar_prefetch = 0 : i64, scratch_operands = 0 : i64, tpu.core_type = #tpu.core_type<tc>, window_params = [{transform_indices = @transform_0, window_bounds = array<i64: 2, 8, 128>}, {pipeline_mode = #tpu.pipeline_mode<synchronous>, transform_indices = @transform_1, window_bounds = array<i64: 1, 128>}, {pipeline_mode = #tpu.pipeline_mode<synchronous>, transform_indices = @transform_2, window_bounds = array<i64: 1, 128>}, {transform_indices = @transform_3, window_bounds = array<i64: 2, 8, 128>}]} {
    %c0 = arith.constant 0 : index
    %c0_0 = arith.constant 0 : index
    %0 = vector.load %arg2[%c0, %c0_0] : memref<1x128xf32, #tpu.memory_space<vmem>>, vector<1x128xf32>
    %c0_1 = arith.constant 0 : index
    %c0_2 = arith.constant 0 : index
    %1 = vector.load %arg3[%c0_1, %c0_2] : memref<1x128xf32, #tpu.memory_space<vmem>>, vector<1x128xf32>
    %c0_3 = arith.constant 0 : index
    %c0_4 = arith.constant 0 : index
    %c0_5 = arith.constant 0 : index
    %2 = vector.load %arg1[%c0_3, %c0_4, %c0_5] : memref<2x8x128xf32, #tpu.memory_space<vmem>>, vector<1x8x128xf32>
    %3 = vector.shape_cast %2 : vector<1x8x128xf32> to vector<8x128xf32>
    %4 = vector.broadcast %0 : vector<1x128xf32> to vector<8x128xf32>
    %5 = arith.mulf %3, %4 : vector<8x128xf32>
    %6 = vector.broadcast %1 : vector<1x128xf32> to vector<8x128xf32>
    %7 = arith.addf %5, %6 : vector<8x128xf32>
    %c0_6 = arith.constant 0 : index
    %c0_7 = arith.constant 0 : index
    %c0_8 = arith.constant 0 : index
    %8 = vector.load %arg4[%c0_6, %c0_7, %c0_8] : memref<2x8x128xf32, #tpu.memory_space<vmem>>, vector<1x8x128xf32>
    %9 = vector.shape_cast %8 : vector<1x8x128xf32> to vector<8x128xf32>
    %10 = vector.shape_cast %7 : vector<8x128xf32> to vector<1x8x128xf32>
    tpu.vector_store %arg4[%c0_6, %c0_7, %c0_8], %10 {strides = array<i32>} : memref<2x8x128xf32, #tpu.memory_space<vmem>>, vector<1x8x128xf32>,
    %c1 = arith.constant 1 : index
    %c0_9 = arith.constant 0 : index
    %c0_10 = arith.constant 0 : index
    %11 = vector.load %arg1[%c1, %c0_9, %c0_10] : memref<2x8x128xf32, #tpu.memory_space<vmem>>, vector<1x8x128xf32>
    %12 = vector.shape_cast %11 : vector<1x8x128xf32> to vector<8x128xf32>
    %13 = vector.broadcast %0 : vector<1x128xf32> to vector<8x128xf32>
    %14 = arith.mulf %12, %13 : vector<8x128xf32>
    %15 = vector.broadcast %1 : vector<1x128xf32> to vector<8x128xf32>
    %16 = arith.addf %14, %15 : vector<8x128xf32>
    %c1_11 = arith.constant 1 : index
    %c0_12 = arith.constant 0 : index
    %c0_13 = arith.constant 0 : index
    %17 = vector.load %arg4[%c1_11, %c0_12, %c0_13] : memref<2x8x128xf32, #tpu.memory_space<vmem>>, vector<1x8x128xf32>
    %18 = vector.shape_cast %17 : vector<1x8x128xf32> to vector<8x128xf32>
    %19 = vector.shape_cast %16 : vector<8x128xf32> to vector<1x8x128xf32>
    tpu.vector_store %arg4[%c1_11, %c0_12, %c0_13], %19 {strides = array<i32>} : memref<2x8x128xf32, #tpu.memory_space<vmem>>, vector<1x8x128xf32>,
    return
  }
  func.func @transform_0(%arg0: i32) -> (i32, i32, i32) {
    %c0_i32 = arith.constant 0 : i32
    %c0_i32_0 = arith.constant 0 : i32
    %c0_i32_1 = arith.constant 0 : i32
    return %arg0, %c0_i32, %c0_i32_0 : i32, i32, i32
  }
  func.func @transform_1(%arg0: i32) -> (i32, i32) {
    %c0_i32 = arith.constant 0 : i32
    %c0_i32_0 = arith.constant 0 : i32
    %c0_i32_1 = arith.constant 0 : i32
    return %c0_i32, %c0_i32_0 : i32, i32
  }
  func.func @transform_2(%arg0: i32) -> (i32, i32) {
    %c0_i32 = arith.constant 0 : i32
    %c0_i32_0 = arith.constant 0 : i32
    %c0_i32_1 = arith.constant 0 : i32
    return %c0_i32, %c0_i32_0 : i32, i32
  }
  func.func @transform_3(%arg0: i32) -> (i32, i32, i32) {
    %c0_i32 = arith.constant 0 : i32
    %c0_i32_0 = arith.constant 0 : i32
    %c0_i32_1 = arith.constant 0 : i32
    return %arg0, %c0_i32, %c0_i32_0 : i32, i32, i32
  }
}

</mosaic_0001>

<bundles_post_ra>
// kernel: temporal_tran_forward.3
= control target key start
LH: loop header
LB: loop body
LE: loop exit
PB: predicated region body
PF: predicated region fallthrough
CT: control target
= control target key end

     0   :  { %s84_s0 = inlined_call_operand.vmem [shape: f32[2,8,128], index: 0, kind: input, shape index: {}, may-alias: {0,3}]   ;;  %s85_s1 = inlined_call_operand.vmem [shape: f32[1,128], index: 1, kind: input, shape index: {}]   ;;  %s86_s2 = inlined_call_operand.vmem [shape: f32[1,128], index: 2, kind: input, shape index: {}]   ;;  %s87_s3 = inlined_call_operand.vmem [shape: f32[2,8,128], index: 3, kind: output, shape index: {}, may-alias: {0,3}]  }
   0x1   :  { %v42_v0 = vld [vmem:[%s85_s1] ss:$0 sm:$0xff]  ;;  %v44_v4 = vld [vmem:[%s84_s0 + $0x8] sm:$0xff] }
   0x2   :  { %v43_v1 = vld [vmem:[%s86_s2] ss:$0 sm:$0xff]  ;;  %v34_v5 = vmul.f32 %v44_v4, %v42_v0 }
   0x3   :  { %v16_v2 = vld [vmem:[%s84_s0] sm:$0xff] }
   0x4   :  { %v23_v3 = vmul.f32 %v42_v0, %v16_v2  ;;  %v35_v7 = vadd.f32 %v43_v1, %v34_v5 }
   0x6   :  { %v30_v6 = vadd.f32 %v43_v1, %v23_v3  ;;  %45 = vst [vmem:[%s87_s3 + $0x8] sm:$0xff] %v35_v7 }
   0x8   :  { %31 = vst [vmem:[%s87_s3] sm:$0xff] %v30_v6 }

// kernel: temporal_tran_forward.2
= control target key start
LH: loop header
LB: loop body
LE: loop exit
PB: predicated region body
PF: predicated region fallthrough
CT: control target
= control target key end

     0   :  { %v2221_v0 = vmov 0.0|0.0   ;;  %vm2222_vm0 = vmmov 0   ;;  %v2223_v8 = vmov 0.0   ;;  %vm62_vm1 = vcmask 1046528   ;;  %s2702_s1 = inlined_call_operand.vmem [shape: f32[3,64,128], index: 1, kind: input, shape index: {}]   ;;  %s2703_s0 = inlined_call_operand.vmem [shape: f32[2,10,64], index: 0, kind: input, shape index: {}]   ;;  %s2704_s8 = inlined_call_operand.vmem [shape: f32[1,128], index: 8, kind: input, shape index: {}]   ;;  %s2705_s2 = inlined_call_operand.vmem [shape: f32[1,128], index: 2, kind: input, shape index: {}]   ;;  %s2706_s7 = inlined_call_operand.vmem [shape: f32[1,128], index: 7, kind: input, shape index: {}]   ;;  %s2707_s4 = inlined_call_operand.vmem [shape: f32[8,8], index: 4, kind: input, shape index: {}]   ;;  %s2708_s3 = inlined_call_operand.vmem [shape: f32[8,8], index: 3, kind: input, shape index: {}]   ;;  %s2709_s5 = inlined_call_operand.vmem [shape: f32[8,1], index: 5, kind: input, shape index: {}]   ;;  %s2710_s9 = inlined_call_operand.vmem [shape: f32[128,8], index: 9, kind: input, shape index: {}]   ;;  %s2711_s6 = inlined_call_operand.vmem [shape: f32[1,8], index: 6, kind: input, shape index: {}]   ;;  %s2712_s10 = inlined_call_operand.vmem [shape: f32[2,8,128], index: 10, kind: output, shape index: {0}]   ;;  %s2713_s11 = inlined_call_operand.vmem [shape: f32[2,2,8], index: 11, kind: output, shape index: {1}]  }
   0x1   :  { %2039 = vmatprep.subr.bf16.mxu0 %v2221_v0  ;;  %v1556_v1 = vld [vmem:[%s2702_s1 + $0x40] sm:$0xff]  ;;  %v1557_v2 = vld [vmem:[%s2702_s1 + $0x48] sm:$0xff]  ;;  %2051 = vmatprep.subr.bf16.mxu1 %v2221_v0  ;;  %v1558_v6 = vld [vmem:[%s2702_s1 + $0x50] sm:$0xff]  ;;  %vm66_vm2 = vcmask 523264   ;;  %vm220_vm3 = vcmask 1045504   ;;  %v2224_v46 = vmov 0   ;;  %v376_v52 = vlaneseq }
   0x2   :  { %v43_v3 = vld [vmem:[%s2702_s1] sm:$0xff]  ;;  %v2296_v4 = vpack.c.bf16 %v1557_v2, %v1556_v1  ;;  %v44_v5 = vld [vmem:[%s2702_s1 + $0x8] sm:$0xff]  ;;  %v1559_v7 = vld [vmem:[%s2702_s1 + $0x58] sm:$0xff]  ;;  %1761 = vmatprep.mubr.msk.f32.mxu0 %vm2222_vm0, %v2223_v8  ;;  %1780 = vmatprep.mubr.msk.f32.mxu1 %vm2222_vm0, %v2223_v8  ;;  %vm386_vm6 = vcmask 64512   ;;  %vm799_vm7 = vcmask 1040384   ;;  %vm801_vm8 = vcmask 58368  }
   0x3   :  { %v2311_v9 = vpack.c.bf16 %v44_v5, %v43_v3  ;;  %v45_v10 = vld [vmem:[%s2702_s1 + $0x10] sm:$0xff]  ;;  %v46_v11 = vld [vmem:[%s2702_s1 + $0x18] sm:$0xff]  ;;  %v2320_v12 = vpack.c.bf16 %v1559_v7, %v1558_v6  ;;  %v1560_v14 = vld [vmem:[%s2702_s1 + $0x60] sm:$0xff]  ;;  %2211 = vset.pattern.permute.xlu0 %v2224_v46  ;;  %2212 = vset.pattern.permute.xlu1 %v2224_v46  ;;  %v377_v54 = vshrl.u32 %v376_v52, 7 }
   0x4   :  { %2041 = vmatpush3.bf16.msra.mxu0 %v2296_v4  ;;  %v2324_v13 = vpack.c.bf16 %v46_v11, %v45_v10  ;;  %v1561_v15 = vld [vmem:[%s2702_s1 + $0x68] sm:$0xff]  ;;  %v47_v16 = vld [vmem:[%s2702_s1 + $0x20] sm:$0xff]  ;;  %v1562_v19 = vld [vmem:[%s2702_s1 + $0x70] sm:$0xff] }
   0x5   :  { %2053 = vmatpush3.bf16.msra.mxu1 %v2311_v9  ;;  %2042 = vmatprep.subr.bf16.mxu0 %v2221_v0  ;;  %v48_v17 = vld [vmem:[%s2702_s1 + $0x28] sm:$0xff]  ;;  %v2340_v18 = vpack.c.bf16 %v1561_v15, %v1560_v14  ;;  %v1563_v21 = vld [vmem:[%s2702_s1 + $0x78] sm:$0xff]  ;;  %v41_v22 = vld [vmem:[%s2703_s0] sm:$0xff]  ;;  %v2431_v55 = vsub.s32 0, %v377_v54 }
   0x6   :  { %2054 = vmatprep.subr.bf16.mxu1 %v2221_v0  ;;  %v2347_v20 = vpack.c.bf16 %v48_v17, %v47_v16  ;;  %v42_v23 = vld [vmem:[%s2703_s0 + $0x8] sm:$0x3]  ;;  %v49_v24 = vld [vmem:[%s2702_s1 + $0x30] sm:$0xff]  ;;  %v50_v25 = vld [vmem:[%s2702_s1 + $0x38] sm:$0xff]  ;;  %v2366_v26 = vpack.c.bf16 %v1563_v21, %v1562_v19  ;;  %v63_v27 = vrot.slane %v41_v22, 1  ;;  %v221_v44 = vrot.slane %v41_v22, 2 }
   0x7   :  { %v64_v28 = vrot.slane %v42_v23, 1  ;;  %v2370_v29 = vpack.c.bf16 %v50_v25, %v49_v24  ;;  %v1566_v30 = vld [vmem:[%s2702_s1 + $0x80] sm:$0xff]  ;;  %v1567_v31 = vld [vmem:[%s2702_s1 + $0x88] sm:$0xff]  ;;  %v1568_v34 = vld [vmem:[%s2702_s1 + $0x90] sm:$0xff]  ;;  %v222_v42 = vrot.slane %v42_v23, 2 }
   0x8   :  { %2044 = vmatpush3.bf16.msra.mxu0 %v2320_v12  ;;  %v2381_v33 = vpack.c.bf16 %v1567_v31, %v1566_v30  ;;  %v1569_v35 = vld [vmem:[%s2702_s1 + $0x98] sm:$0xff]  ;;  %v1570_v37 = vld [vmem:[%s2702_s1 + $0xa0] sm:$0xff]  ;;  %v1571_v38 = vld [vmem:[%s2702_s1 + $0xa8] sm:$0xff] }
   0x9   :  { %2056 = vmatpush3.bf16.msra.mxu1 %v2324_v13  ;;  %2045 = vmatprep.subr.bf16.mxu0 %v2221_v0  ;;  %v65_v32 = vsel %vm62_vm1, %v63_v27, %v64_v28  ;;  %v2395_v36 = vpack.c.bf16 %v1569_v35, %v1568_v34  ;;  %v2409_v39 = vpack.c.bf16 %v1571_v38, %v1570_v37  ;;  %v1572_v40 = vld [vmem:[%s2702_s1 + $0xb0] sm:$0xff]  ;;  %v1573_v41 = vld [vmem:[%s2702_s1 + $0xb8] sm:$0xff]  ;;  %v38_v53 = vld [vmem:[%s2704_s8] sm:$0x1] }
   0xa   :  { %2057 = vmatprep.subr.bf16.mxu1 %v2221_v0  ;;  %v2419_v43 = vpack.c.bf16 %v1573_v41, %v1572_v40  ;;  %v223_v45 = vsel %vm220_vm3, %v221_v44, %v222_v42  ;;  %vm39_vm4 = vcmp.ne.f32.partialorder %v38_v53, 0.0  ;;  %v2437_v58 = vld [vmem:[%s2705_s2] ss:$0 sm:$0xff]  ;;  %v641_v24 = vld [vmem:[%s2710_s9 + $0x8] sm:$0xff]  ;;  %v642_v25 = vld [vmem:[%s2710_s9 + $0x10] sm:$0xff] }
   0xb   :  { %v375_v56 = vsel %vm39_vm4, 1, %v2224_v46  ;;  %v2449_v2 = vld [vmem:[%s2706_s7] sm:$0x1]  ;;  %v643_v28 = vld [vmem:[%s2710_s9 + $0x18] sm:$0xff]  ;;  %v646_v35 = vld [vmem:[%s2710_s9 + $0x30] sm:$0xff] }
   0xc   :  { %2047 = vmatpush3.bf16.msra.mxu0 %v2340_v18  ;;  %v379_v57 = vrot.slane %v375_v56, %v2431_v55  ;;  %v2458_v3 = vld [vmem:[%s2707_s4] sm:$0xff]  ;;  %v2497_v30 = vpack.c.bf16 %v643_v28, %v642_v25  ;;  %v647_v37 = vld [vmem:[%s2710_s9 + $0x38] sm:$0xff]  ;;  %v649_v41 = vld [vmem:[%s2710_s9 + $0x48] sm:$0xff] }
   0xd   :  { %2059 = vmatpush3.bf16.msra.mxu1 %v2347_v20  ;;  %2048 = vmatprep.subr.bf16.mxu0 %v2221_v0  ;;  %v2468_v11 = vld [vmem:[%s2708_s3] sm:$0xff]  ;;  %v2517_v38 = vpack.c.bf16 %v647_v37, %v646_v35  ;;  %v650_v54 = vld [vmem:[%s2710_s9 + $0x50] sm:$0xff]  ;;  %v651_v56 = vld [vmem:[%s2710_s9 + $0x58] sm:$0xff] }
   0xe   :  { %2060 = vmatprep.subr.bf16.mxu1 %v2221_v0  ;;  %vm2439_vm5 = vcmp.eq.s32.totalorder %v379_v57, 1  ;;  %v2479_v16 = vld [vmem:[%s2709_s5] sm:$0xff]  ;;  %v2555_v57 = vpack.c.bf16 %v651_v56, %v650_v54  ;;  %v1581_v35 = vld [vmem:[%s2703_s0 + $0x18] sm:$0x3] }
   0xf   :  { %v640_v23 = vld [vmem:[%s2710_s9] sm:$0xff]  ;;  %v825_v37 = vrot.slane %v1581_v35, 1 }
  0x10   :  { %2050 = vmatpush3.bf16.msra.mxu0 %v2366_v26  ;;  %v2491_v27 = vpack.c.bf16 %v641_v24, %v640_v23  ;;  %v644_v31 = vld [vmem:[%s2710_s9 + $0x20] sm:$0xff] }
  0x11   :  { %2062 = vmatpush3.bf16.msra.mxu1 %v2370_v29  ;;  %2063 = vmatprep.subr.bf16.mxu0 %v2221_v0  ;;  %v648_v40 = vld [vmem:[%s2710_s9 + $0x40] sm:$0xff] }
  0x12   :  { %1802 = vmatprep.subr.mxu1 %v2223_v8  ;;  %v2527_v42 = vpack.c.bf16 %v649_v41, %v648_v40  ;;  %v385_v44 = vld [vmem:[%s2711_s6] sm:$0x1] }
  0x13   :  { %1762 = vmatmul.mubr.msk.f32.vlgmr.msra.gmra.mrb[0].mxu0 %vm66_vm2, %v65_v32  ;;  %v645_v32 = vld [vmem:[%s2710_s9 + $0x28] sm:$0xff] }
  0x14   :  { %1781 = vmatmul.mubr.msk.f32.vlgmr.msra.gmra.mrb[0].mxu1 %vm66_vm2, %v41_v22  ;;  %2065 = vmatpush3.bf16.msra.mxu0 %v2381_v33  ;;  %v2507_v34 = vpack.c.bf16 %v645_v32, %v644_v31 }
  0x15   :  { %2066 = vmatprep.subr.bf16.mxu0 %v2221_v0  ;;  %1799 = vmatprep.mubr.msk.f32.mxu0 %vm2222_vm0, %v2223_v8 }
  0x16   :  { %1804 = vmatprep.mubr.msk.f32.mxu1 %vm2222_vm0, %v2223_v8 }
  0x18   :  { %2068 = vmatpush3.bf16.msra.mxu0 %v2395_v36 }
  0x19   :  { %2069 = vmatprep.subr.bf16.mxu0 %v2221_v0 }
  0x1c   :  { %2071 = vmatpush3.bf16.msra.mxu0 %v2409_v39 }
  0x1d   :  { %2072 = vmatprep.subr.bf16.mxu0 %v2221_v0 }
  0x20   :  { %2074 = vmatpush3.bf16.msra.mxu0 %v2419_v43 }
  0x21   :  { %2075 = vmatprep.subr.bf16.mxu0 %v2221_v0 }
  0x23   :  { %1800 = vmatmul.mubr.msk.f32.vlgmr.msra.gmra.mrb[2].mxu0 %vm66_vm2, %v223_v45 }
  0x24   :  { %1854 = vmatprep.mubr.msk.f32.mxu0 %vm2222_vm0, %v2223_v8  ;;  %2077 = vmatpush3.bf16.msra.mxu0 %v2491_v27 }
  0x25   :  { %2078 = vmatprep.subr.bf16.mxu0 %v2221_v0 }
  0x28   :  { %2080 = vmatpush3.bf16.msra.mxu0 %v2497_v30 }
  0x29   :  { %2081 = vmatprep.subr.bf16.mxu0 %v2221_v0 }
  0x2c   :  { %2083 = vmatpush3.bf16.msra.mxu0 %v2507_v34 }
  0x2d   :  { %2084 = vmatprep.subr.bf16.mxu0 %v2221_v0 }
  0x30   :  { %2086 = vmatpush3.bf16.msra.mxu0 %v2517_v38 }
  0x31   :  { %2087 = vmatprep.subr.bf16.mxu0 %v2221_v0 }
  0x34   :  { %2089 = vmatpush3.bf16.msra.mxu0 %v2527_v42 }
  0x35   :  { %2090 = vmatprep.subr.bf16.mxu0 %v2221_v0 }
  0x38   :  { %2092 = vmatpush3.bf16.msra.mxu0 %v2555_v57 }
  0x39   :  { %2093 = vmatprep.subr.bf16.mxu0 %v2221_v0 }
  0xe6   :  { %v135_v47 = vpop.f32.mrb[0].mxu0 }
  0xe7   :  { %v1763_v48 = vpop.f32.mrb[1].mxu0  ;;  %v207_v49 = vpop.f32.mrb[0].mxu1 }
  0xe8   :  { %v208_v50 = vadd.f32 %v207_v49, %v135_v47  ;;  %v1782_v51 = vpop.f32.mrb[1].mxu1 }
  0xf6   :  { %v292_v59 = vpop.f32.mrb[2].mxu0 }
  0xf7   :  { %v296_v60 = vadd.f32 %v292_v59, %v208_v50  ;;  %v1801_v61 = vpop.f32.mrb[3].mxu0  ;;  %v652_v59 = vld [vmem:[%s2710_s9 + $0x60] sm:$0xff] }
  0xf9   :  { %v303_v63 = vadd.f32 %v2437_v58, %v296_v60  ;;  %v653_v60 = vld [vmem:[%s2710_s9 + $0x68] sm:$0xff] }
  0xfa   :  { %v2567_v61 = vpack.c.bf16 %v653_v60, %v652_v59 }
  0xfb   :  { %1803 = vmatpush3.xpose.msra.mxu1 %v303_v63  ;;  %v381_v1 = vsel %vm2439_vm5, %v303_v63, -3.4028235e+38 }
  0xfc   :  { %382 = vmax.xlane.f32.xlu0 %v381_v1  ;;  %1807 = vmatprep.subr.mxu1 %v2223_v8  ;;  %v655_v1 = vld [vmem:[%s2710_s9 + $0x78] sm:$0xff] }
  0xfd   :  { %2095 = vmatpush3.bf16.msra.mxu0 %v2567_v61 }
  0xfe   :  { %1805 = vmatmul.mubr.f32.vlgmr.msra.gmra.mrb[2].mxu1 %v2449_v2  ;;  %2096 = vmatprep.subr.bf16.mxu0 %v2221_v0 }
  0xff   :  { %1809 = vmatprep.mubr.msk.f32.mxu1 %vm2222_vm0, %v2223_v8  ;;  %1808 = vmatpush3.msra.mxu1 %v2458_v3 }
 0x100   :  { %1812 = vmatprep.subr.mxu1 %v2223_v8 }
 0x189   :  { %v383_v10 = vpop.xlane.xlu0 %382 }
 0x1d1   :  { %v370_v5 = vpop.f32.mrb[2].mxu1 }
 0x1d2   :  { %v374_v6 = vmul.f32 0.015625, %v370_v5  ;;  %v1806_v7 = vpop.f32.mrb[3].mxu1 }
 0x1d4   :  { %1810 = vmatmul.mubr.msk.f32.vlgmr.msra.gmra.mrb[4].mxu1 %vm386_vm6, %v374_v6 }
 0x1d5   :  { %1813 = vmatpush3.msra.mxu1 %v383_v10  ;;  %1814 = vmatprep.mubr.msk.f32.mxu1 %vm2222_vm0, %v2223_v8 }
 0x1d6   :  { %1817 = vmatprep.subr.mxu1 %v2223_v8 }
 0x1d8   :  { %1815 = vmatmul.mubr.msk.f32.vlgmr.msra.gmra.mrb[6].mxu1 %vm386_vm6, %v2468_v11 }
 0x1d9   :  { %1818 = vmatpush3.msra.mxu1 %v303_v63  ;;  %1819 = vmatprep.mubr.msk.f32.mxu1 %vm2222_vm0, %v2223_v8  ;;  %v654_v63 = vld [vmem:[%s2710_s9 + $0x70] sm:$0xff] }
 0x1da   :  { %2099 = vmatprep.subr.bf16.mxu1 %v2221_v0  ;;  %v2579_v5 = vpack.c.bf16 %v655_v1, %v654_v63  ;;  %v1131_v63 = vld [vmem:[%s2711_s6] sm:$0x1] }
 0x1dc   :  { %2098 = vmatpush3.bf16.msra.mxu0 %v2579_v5 }
 0x1dd   :  { %2123 = vmatprep.subr.bf16.mxu0 %v2221_v0 }
 0x2a7   :  { %v456_v14 = vpop.f32.mrb[4].mxu1 }
 0x2a8   :  { %v1811_v15 = vpop.f32.mrb[5].mxu1  ;;  %v457_v45 = vadd.f32 %v456_v14, %v385_v44 }
 0x2aa   :  { %v460_v46 = vmax.f32 %v457_v45, 0.0 }
 0x2ab   :  { %v532_v17 = vpop.f32.mrb[6].mxu1 }
 0x2ac   :  { %v533_v19 = vadd.f32 %v532_v17, %v2479_v16  ;;  %v1816_v21 = vpop.f32.mrb[7].mxu1  ;;  %v545_v47 = vrot.slane %v460_v46, %v2431_v55 }
 0x2ae   :  { %v536_v22 = vmax.f32 %v533_v19, 0.0 }
 0x2b0   :  { %539 = vperm.xlu0 %2211, %v536_v22  }
 0x32f   :  { %v540_v48 = vpop.permute.xlu0 %539 }
 0x330   :  { %v546_v49 = vmul.f32 %v545_v47, %v540_v48 }
 0x332   :  { %v1578_v50 = vmul.f32 -1.442695, %v546_v49 }
 0x334   :  { %2213 = vpow2.f32 %v1578_v50 }
 0x33e   :  { %v2214_v51 = vpop.eup %2213 }
 0x33f   :  { %v550_v52 = vadd.f32 1.0, %v2214_v51 }
 0x341   :  { %2215 = vrcp.f32 %v550_v52 }
 0x34b   :  { %v2216_v53 = vpop.eup %2215 }
 0x34c   :  { %1820 = vmatmul.mubr.msk.f32.vlgmr.msra.gmra.mrb[8].mxu1 %vm386_vm6, %v2216_v53 }
 0x34d   :  { %2101 = vmatpush3.bf16.msra.mxu1 %v2491_v27  ;;  %1889 = vmatprep.mubr.msk.f32.mxu1 %vm2222_vm0, %v2223_v8 }
 0x34e   :  { %2102 = vmatprep.subr.bf16.mxu1 %v2221_v0 }
 0x351   :  { %2104 = vmatpush3.bf16.msra.mxu1 %v2497_v30 }
 0x352   :  { %2105 = vmatprep.subr.bf16.mxu1 %v2221_v0 }
 0x355   :  { %2107 = vmatpush3.bf16.msra.mxu1 %v2507_v34 }
 0x356   :  { %2108 = vmatprep.subr.bf16.mxu1 %v2221_v0 }
 0x359   :  { %2110 = vmatpush3.bf16.msra.mxu1 %v2517_v38 }
 0x35a   :  { %2111 = vmatprep.subr.bf16.mxu1 %v2221_v0 }
 0x35d   :  { %2113 = vmatpush3.bf16.msra.mxu1 %v2527_v42 }
 0x35e   :  { %2114 = vmatprep.subr.bf16.mxu1 %v2221_v0 }
 0x361   :  { %2116 = vmatpush3.bf16.msra.mxu1 %v2555_v57 }
 0x362   :  { %2117 = vmatprep.subr.bf16.mxu1 %v2221_v0 }
 0x365   :  { %2119 = vmatpush3.bf16.msra.mxu1 %v2567_v61 }
 0x366   :  { %2120 = vmatprep.subr.bf16.mxu1 %v2221_v0 }
 0x369   :  { %2122 = vmatpush3.bf16.msra.mxu1 %v2579_v5 }
 0x36a   :  { %2135 = vmatprep.subr.bf16.mxu1 %v2221_v0 }
 0x41f   :  { %v622_v6 = vpop.f32.mrb[8].mxu1 }
 0x420   :  { %626 = vst [vmem:[%s2712_s10] sm:$0xff] %v622_v6  ;;  %v627_v7 = vrot.slane %v622_v6, 4  ;;  %v633_v10 = vmul.f32 %v622_v6, %v622_v6  ;;  %v1821_v14 = vpop.f32.mrb[9].mxu1 }
 0x422   :  { %v628_v15 = vadd.f32 %v627_v7, %v622_v6  ;;  %v634_v17 = vrot.slane %v633_v10, 4 }
 0x424   :  { %v629_v19 = vrot.slane %v628_v15, 2  ;;  %v635_v21 = vadd.f32 %v634_v17, %v633_v10 }
 0x426   :  { %v630_v22 = vadd.f32 %v629_v19, %v628_v15  ;;  %v636_v23 = vrot.slane %v635_v21, 2 }
 0x428   :  { %v631_v24 = vrot.slane %v630_v22, 1  ;;  %v637_v25 = vadd.f32 %v636_v23, %v635_v21 }
 0x42a   :  { %v632_v28 = vadd.f32 %v631_v24, %v630_v22  ;;  %v638_v31 = vrot.slane %v637_v25, 1 }
 0x42c   :  { %1855 = vmatmul.mubr.f32.vlgmr.msra.gmra.mrb[4].mxu0 %v632_v28  ;;  %v639_v32 = vadd.f32 %v638_v31, %v637_v25 }
 0x42d   :  { %2125 = vmatpush3.bf16.msra.mxu0 %v2296_v4  ;;  %1908 = vmatprep.mubr.msk.f32.mxu0 %vm2222_vm0, %v2223_v8  ;;  %v1580_v4 = vld [vmem:[%s2703_s0 + $0x10] sm:$0xff] }
 0x42e   :  { %1890 = vmatmul.mubr.f32.vlgmr.msra.gmra.mrb[10].mxu1 %v639_v32  ;;  %2126 = vmatprep.subr.bf16.mxu0 %v2221_v0 }
 0x42f   :  { %2137 = vmatpush3.bf16.msra.mxu1 %v2311_v9  ;;  %1927 = vmatprep.mubr.msk.f32.mxu1 %vm2222_vm0, %v2223_v8  ;;  %v824_v9 = vrot.slane %v1580_v4, 1 }
 0x430   :  { %2138 = vmatprep.subr.bf16.mxu1 %v2221_v0 }
 0x431   :  { %2128 = vmatpush3.bf16.msra.mxu0 %v2320_v12  ;;  %v826_v12 = vsel %vm62_vm1, %v824_v9, %v825_v37 }
 0x432   :  { %2129 = vmatprep.subr.bf16.mxu0 %v2221_v0 }
 0x433   :  { %2140 = vmatpush3.bf16.msra.mxu1 %v2324_v13  ;;  %v979_v13 = vrot.slane %v1580_v4, 2 }
 0x434   :  { %2141 = vmatprep.subr.bf16.mxu1 %v2221_v0 }
 0x435   :  { %2131 = vmatpush3.bf16.msra.mxu0 %v2340_v18  ;;  %v980_v18 = vrot.slane %v1581_v35, 2 }
 0x436   :  { %2132 = vmatprep.subr.bf16.mxu0 %v2221_v0 }
 0x437   :  { %2143 = vmatpush3.bf16.msra.mxu1 %v2347_v20  ;;  %v981_v20 = vsel %vm220_vm3, %v979_v13, %v980_v18 }
 0x438   :  { %2144 = vmatprep.subr.bf16.mxu1 %v2221_v0 }
 0x439   :  { %2134 = vmatpush3.bf16.msra.mxu0 %v2366_v26 }
 0x43a   :  { %2147 = vmatprep.subr.bf16.mxu0 %v2221_v0 }
 0x43b   :  { %2146 = vmatpush3.bf16.msra.mxu1 %v2370_v29 }
 0x43c   :  { %1909 = vmatmul.mubr.msk.f32.vlgmr.msra.gmra.mrb[6].mxu0 %vm66_vm2, %v826_v12  ;;  %1949 = vmatprep.subr.mxu1 %v2223_v8 }
 0x43d   :  { %2149 = vmatpush3.bf16.msra.mxu0 %v2381_v33  ;;  %1946 = vmatprep.mubr.msk.f32.mxu0 %vm2222_vm0, %v2223_v8 }
 0x43e   :  { %1928 = vmatmul.mubr.msk.f32.vlgmr.msra.gmra.mrb[12].mxu1 %vm66_vm2, %v1580_v4  ;;  %2150 = vmatprep.subr.bf16.mxu0 %v2221_v0 }
 0x43f   :  { %1951 = vmatprep.mubr.msk.f32.mxu1 %vm2222_vm0, %v2223_v8 }
 0x441   :  { %2152 = vmatpush3.bf16.msra.mxu0 %v2395_v36 }
 0x442   :  { %2153 = vmatprep.subr.bf16.mxu0 %v2221_v0 }
 0x445   :  { %2155 = vmatpush3.bf16.msra.mxu0 %v2409_v39 }
 0x446   :  { %2156 = vmatprep.subr.bf16.mxu0 %v2221_v0 }
 0x449   :  { %2158 = vmatpush3.bf16.msra.mxu0 %v2419_v43 }
 0x44a   :  { %2159 = vmatprep.subr.bf16.mxu0 %v2221_v0 }
 0x44c   :  { %1947 = vmatmul.mubr.msk.f32.vlgmr.msra.gmra.mrb[8].mxu0 %vm66_vm2, %v981_v20 }
 0x44d   :  { %2161 = vmatpush3.bf16.msra.mxu0 %v2491_v27  ;;  %2001 = vmatprep.mubr.msk.f32.mxu0 %vm2222_vm0, %v2223_v8 }
 0x44e   :  { %2162 = vmatprep.subr.bf16.mxu0 %v2221_v0 }
 0x451   :  { %2164 = vmatpush3.bf16.msra.mxu0 %v2497_v30 }
 0x452   :  { %2165 = vmatprep.subr.bf16.mxu0 %v2221_v0 }
 0x455   :  { %2167 = vmatpush3.bf16.msra.mxu0 %v2507_v34 }
 0x456   :  { %2168 = vmatprep.subr.bf16.mxu0 %v2221_v0 }
 0x459   :  { %2170 = vmatpush3.bf16.msra.mxu0 %v2517_v38 }
 0x45a   :  { %2171 = vmatprep.subr.bf16.mxu0 %v2221_v0 }
 0x45d   :  { %2173 = vmatpush3.bf16.msra.mxu0 %v2527_v42 }
 0x45e   :  { %2174 = vmatprep.subr.bf16.mxu0 %v2221_v0 }
 0x461   :  { %2176 = vmatpush3.bf16.msra.mxu0 %v2555_v57 }
 0x462   :  { %2177 = vmatprep.subr.bf16.mxu0 %v2221_v0 }
 0x465   :  { %2179 = vmatpush3.bf16.msra.mxu0 %v2567_v61 }
 0x466   :  { %2180 = vmatprep.subr.bf16.mxu0 %v2221_v0 }
 0x469   :  { %2182 = vmatpush3.bf16.msra.mxu0 %v2579_v5 }
 0x4ff   :  { %v722_v26 = vpop.f32.mrb[4].mxu0 }
 0x500   :  { %v1856_v29 = vpop.f32.mrb[5].mxu0 }
 0x501   :  { %v792_v33 = vpop.f32.mrb[10].mxu1 }
 0x502   :  { %v797_v36 = vrot.slane %v792_v33, 7  ;;  %v1891_v39 = vpop.f32.mrb[11].mxu1 }
 0x504   :  { %v800_v43 = vsel %vm799_vm7, %v722_v26, %v797_v36 }
 0x505   :  { %802 = vst.msk [vmem:[%s2713_s11] sm:$0x3] %vm801_vm8, %v800_v43 }
 0x50f   :  { %v895_v40 = vpop.f32.mrb[6].mxu0 }
 0x510   :  { %v1910_v41 = vpop.f32.mrb[7].mxu0 }
 0x511   :  { %v967_v44 = vpop.f32.mrb[12].mxu1 }
 0x512   :  { %v968_v45 = vadd.f32 %v967_v44, %v895_v40  ;;  %v1929_v46 = vpop.f32.mrb[13].mxu1 }
 0x51f   :  { %v1050_v47 = vpop.f32.mrb[8].mxu0 }
 0x520   :  { %v1054_v48 = vadd.f32 %v1050_v47, %v968_v45  ;;  %v1948_v49 = vpop.f32.mrb[9].mxu0 }
 0x522   :  { %v1055_v50 = vadd.f32 %v2437_v58, %v1054_v48 }
 0x524   :  { %1950 = vmatpush3.xpose.msra.mxu1 %v1055_v50  ;;  %v1127_v51 = vsel %vm2439_vm5, %v1055_v50, -3.4028235e+38 }
 0x525   :  { %1128 = vmax.xlane.f32.xlu1 %v1127_v51  ;;  %1954 = vmatprep.subr.mxu1 %v2223_v8 }
 0x527   :  { %1952 = vmatmul.mubr.f32.vlgmr.msra.gmra.mrb[14].mxu1 %v2449_v2 }
 0x528   :  { %1955 = vmatpush3.msra.mxu1 %v2458_v3  ;;  %1956 = vmatprep.mubr.msk.f32.mxu1 %vm2222_vm0, %v2223_v8 }
 0x529   :  { %1959 = vmatprep.subr.mxu1 %v2223_v8 }
 0x5b2   :  { %v1129_v58 = vpop.xlane.xlu1 %1128 }
 0x5fa   :  { %v1122_v52 = vpop.f32.mrb[14].mxu1 }
 0x5fb   :  { %v1126_v53 = vmul.f32 0.015625, %v1122_v52  ;;  %v1953_v54 = vpop.f32.mrb[15].mxu1 }
 0x5fd   :  { %1957 = vmatmul.mubr.msk.f32.vlgmr.msra.gmra.mrb[16].mxu1 %vm386_vm6, %v1126_v53 }
 0x5fe   :  { %1960 = vmatpush3.msra.mxu1 %v1129_v58  ;;  %1961 = vmatprep.mubr.msk.f32.mxu1 %vm2222_vm0, %v2223_v8 }
 0x5ff   :  { %1964 = vmatprep.subr.mxu1 %v2223_v8 }
 0x601   :  { %1962 = vmatmul.mubr.msk.f32.vlgmr.msra.gmra.mrb[18].mxu1 %vm386_vm6, %v2468_v11 }
 0x602   :  { %1965 = vmatpush3.msra.mxu1 %v1055_v50  ;;  %1966 = vmatprep.mubr.msk.f32.mxu1 %vm2222_vm0, %v2223_v8 }
 0x603   :  { %2183 = vmatprep.subr.bf16.mxu1 %v2221_v0 }
 0x6d0   :  { %v1201_v62 = vpop.f32.mrb[16].mxu1 }
 0x6d1   :  { %v1958_v2 = vpop.f32.mrb[17].mxu1  ;;  %v1202_v1 = vadd.f32 %v1201_v62, %v1131_v63 }
 0x6d3   :  { %v1205_v11 = vmax.f32 %v1202_v1, 0.0 }
 0x6d4   :  { %v1277_v3 = vpop.f32.mrb[18].mxu1 }
 0x6d5   :  { %v1278_v56 = vadd.f32 %v1277_v3, %v2479_v16  ;;  %v1963_v59 = vpop.f32.mrb[19].mxu1  ;;  %v1290_v6 = vrot.slane %v1205_v11, %v2431_v55 }
 0x6d7   :  { %v1281_v60 = vmax.f32 %v1278_v56, 0.0 }
 0x6d9   :  { %1284 = vperm.xlu1 %2212, %v1281_v60  }
 0x758   :  { %v1285_v7 = vpop.permute.xlu1 %1284 }
 0x759   :  { %v1291_v10 = vmul.f32 %v1290_v6, %v1285_v7 }
 0x75b   :  { %v1603_v14 = vmul.f32 -1.442695, %v1291_v10 }
 0x75d   :  { %2217 = vpow2.f32 %v1603_v14 }
 0x767   :  { %v2218_v15 = vpop.eup %2217 }
 0x768   :  { %v1295_v17 = vadd.f32 1.0, %v2218_v15 }
 0x76a   :  { %2219 = vrcp.f32 %v1295_v17 }
 0x774   :  { %v2220_v19 = vpop.eup %2219 }
 0x775   :  { %1967 = vmatmul.mubr.msk.f32.vlgmr.msra.gmra.mrb[20].mxu1 %vm386_vm6, %v2220_v19 }
 0x776   :  { %2185 = vmatpush3.bf16.msra.mxu1 %v2491_v27  ;;  %2036 = vmatprep.mubr.msk.f32.mxu1 %vm2222_vm0, %v2223_v8 }
 0x777   :  { %2186 = vmatprep.subr.bf16.mxu1 %v2221_v0 }
 0x77a   :  { %2188 = vmatpush3.bf16.msra.mxu1 %v2497_v30 }
 0x77b   :  { %2189 = vmatprep.subr.bf16.mxu1 %v2221_v0 }
 0x77e   :  { %2191 = vmatpush3.bf16.msra.mxu1 %v2507_v34 }
 0x77f   :  { %2192 = vmatprep.subr.bf16.mxu1 %v2221_v0 }
 0x782   :  { %2194 = vmatpush3.bf16.msra.mxu1 %v2517_v38 }
 0x783   :  { %2195 = vmatprep.subr.bf16.mxu1 %v2221_v0 }
 0x786   :  { %2197 = vmatpush3.bf16.msra.mxu1 %v2527_v42 }
 0x787   :  { %2198 = vmatprep.subr.bf16.mxu1 %v2221_v0 }
 0x78a   :  { %2200 = vmatpush3.bf16.msra.mxu1 %v2555_v57 }
 0x78b   :  { %2201 = vmatprep.subr.bf16.mxu1 %v2221_v0 }
 0x78e   :  { %2203 = vmatpush3.bf16.msra.mxu1 %v2567_v61 }
 0x78f   :  { %2204 = vmatprep.subr.bf16.mxu1 %v2221_v0 }
 0x792   :  { %2206 = vmatpush3.bf16.msra.mxu1 %v2579_v5 }
 0x848   :  { %v1367_v8 = vpop.f32.mrb[20].mxu1 }
 0x849   :  { %1605 = vst [vmem:[%s2712_s10 + $0x8] sm:$0xff] %v1367_v8  ;;  %v1373_v55 = vrot.slane %v1367_v8, 4  ;;  %v1379_v16 = vmul.f32 %v1367_v8, %v1367_v8  ;;  %v1968_v27 = vpop.f32.mrb[21].mxu1 }
 0x84b   :  { %v1374_v30 = vadd.f32 %v1373_v55, %v1367_v8  ;;  %v1380_v34 = vrot.slane %v1379_v16, 4 }
 0x84d   :  { %v1375_v38 = vrot.slane %v1374_v30, 2  ;;  %v1381_v42 = vadd.f32 %v1380_v34, %v1379_v16 }
 0x84f   :  { %v1376_v57 = vadd.f32 %v1375_v38, %v1374_v30  ;;  %v1382_v21 = vrot.slane %v1381_v42, 2 }
 0x851   :  { %v1377_v22 = vrot.slane %v1376_v57, 1  ;;  %v1383_v61 = vadd.f32 %v1382_v21, %v1381_v42 }
 0x853   :  { %v1378_v23 = vadd.f32 %v1377_v22, %v1376_v57  ;;  %v1384_v0 = vrot.slane %v1383_v61, 1 }
 0x855   :  { %2002 = vmatmul.mubr.f32.vlgmr.msra.gmra.mrb[10].mxu0 %v1378_v23  ;;  %v1385_v5 = vadd.f32 %v1384_v0, %v1383_v61 }
 0x857   :  { %2037 = vmatmul.mubr.f32.vlgmr.msra.gmra.mrb[22].mxu1 %v1385_v5 }
 0x928   :  { %v1468_v24 = vpop.f32.mrb[10].mxu0 }
 0x929   :  { %v2003_v25 = vpop.f32.mrb[11].mxu0 }
 0x92a   :  { %v1538_v28 = vpop.f32.mrb[22].mxu1 }
 0x92b   :  { %v1543_v31 = vrot.slane %v1538_v28, 7  ;;  %v2038_v32 = vpop.f32.mrb[23].mxu1 }
 0x92d   :  { %v1545_v4 = vsel %vm799_vm7, %v1468_v24, %v1543_v31 }
 0x92e   :  { %1606 = vst.msk [vmem:[%s2713_s11 + $0x2] sm:$0x3] %vm801_vm8, %v1545_v4 }

</bundles_post_ra>
